<compile_context>
chip_gen: v6e
topology: v6e:2x2x1
jax: 0.10.0
libtpu: 0.0.40
codegen_flags: <defaults>
</compile_context>

<pallas_src>
import functools

import jax
import jax.numpy as jnp
from jax import lax
from jax.experimental import pallas as pl
from jax.experimental.pallas import tpu as pltpu

_LANES = 128
_SUBLANES = 8


def _int_pow(v, k):
    out = v
    for _ in range(int(k) - 1):
        out = out * v
    return out


def _dcs_kernel(x_ref, t_ref, num_ref, den_ref, num_acc, den_acc, *,
                alpha, p, n_valid, block_rows, steps_per_split, mask_any):
    c = pl.program_id(0)          # split (TensorCore) index
    j = pl.program_id(1)          # row-block index within this split

    @pl.when(j == 0)
    def _init():
        num_acc[...] = jnp.zeros_like(num_acc)
        den_acc[...] = jnp.zeros_like(den_acc)

    x = x_ref[...].astype(jnp.float32)
    y = t_ref[...].astype(jnp.float32)

    # Numerically stable sigmoid sharing one exp (EUP) between pt and 1-pt.
    e = jnp.exp(-jnp.abs(x))
    r = 1.0 / (1.0 + e)
    pt = jnp.where(x >= 0, r, e * r)          # sigmoid(x)
    omp = 1.0 - pt                            # 1 - sigmoid(x)

    # (1 - pt) ** alpha
    if alpha == 0.0:
        w = jnp.ones_like(pt)
    elif float(alpha) == 1.0:
        w = omp
    elif float(alpha) == int(alpha) and int(alpha) >= 1:
        w = _int_pow(omp, int(alpha))
    else:
        # exp(alpha * log(t)); t == 0 -> exp(-inf) == 0, matching 0 ** alpha.
        w = jnp.exp(alpha * jnp.log(omp))
    pre_pos = pt * w

    # pre_pos ** p and target ** p (integer p -> explicit multiplies, no pow).
    if float(p) == int(p) and int(p) >= 1:
        pp = _int_pow(pre_pos, int(p))
        tp = _int_pow(y, int(p))
    else:
        pp = jnp.power(pre_pos, p)            # never traced for default p=2
        tp = jnp.power(y, p)

    num_c = pre_pos * y
    den_c = pp + tp

    if mask_any:
        start_row = (c * steps_per_split + j) * block_rows
        overruns = (start_row + block_rows) * _LANES > n_valid

        @pl.when(overruns)
        def _masked_accumulate():
            ridx = lax.broadcasted_iota(jnp.int32, num_c.shape, 1)
            lidx = lax.broadcasted_iota(jnp.int32, num_c.shape, 2)
            elem = (start_row + ridx) * _LANES + lidx
            valid = elem < n_valid
            # num_c/den_c were computed on pad / out-of-range lanes; the select
            # discards them.  Do NOT hoist or remove this mask.
            num_acc[...] += jnp.where(valid, num_c, 0.0)
            den_acc[...] += jnp.where(valid, den_c, 0.0)

        @pl.when(jnp.logical_not(overruns))
        def _full_accumulate():
            num_acc[...] += num_c
            den_acc[...] += den_c
    else:
        # Covered span exactly equals the valid data: no masking anywhere.
        num_acc[...] += num_c
        den_acc[...] += den_c

    @pl.when(j == steps_per_split - 1)
    def _finalize():
        # One sublane reduce per split; the lane reduce (and the division)
        # finish in the wrapper on a (splits, B, 128) array.
        num_ref[...] = jnp.sum(num_acc[...], axis=1)[None]
        den_ref[...] = jnp.sum(den_acc[...], axis=1)[None]


def dcs_loss(inputs, target, smooth=1e-4, p=2, alpha=0.01, reduction="mean",
             target_block_bytes=2 << 20, num_splits=2):
    """Pallas implementation of DCSLoss(smooth, p, alpha, reduction).forward.

    Pass targets in a narrow dtype (bf16/int8) at the call site when possible:
    the kernel upcasts in-VMEM, halving that input's HBM traffic.
    """
    assert inputs.shape[0] == target.shape[0], \
        "predict & target batch size don't match"
    B = inputs.shape[0]
    x2 = inputs.reshape(B, -1)
    t2 = target.reshape(B, -1)
    assert x2.shape == t2.shape, "flattened predict & target sizes don't match"
    N = x2.shape[1]
    assert N > 0

    # View the feature axis lane-dense as (B, rows, 128).  Pad to a multiple
    # of 128 if needed; padded elements are masked out in-kernel.
    n_pad = pl.cdiv(N, _LANES) * _LANES
    if n_pad != N:
        # TODO(synk): stream the ragged tail with a small separate 2-D pass to
        # avoid this host-side pad copy for huge, non-128-divisible N.
        x2 = jnp.pad(x2, ((0, 0), (0, n_pad - N)))
        t2 = jnp.pad(t2, ((0, 0), (0, n_pad - N)))
    rows = n_pad // _LANES
    x3 = x2.reshape(B, rows, _LANES)
    t3 = t2.reshape(B, rows, _LANES)

    # Size the row-block by BYTES (~target_block_bytes per input buffer) using
    # the real element sizes; keep it sublane-dense (multiple of 8 rows).
    itemsize = max(x3.dtype.itemsize, t3.dtype.itemsize)
    block_rows = target_block_bytes // (B * _LANES * itemsize)
    block_rows = max(_SUBLANES, (block_rows // _SUBLANES) * _SUBLANES)
    if block_rows >= rows:
        block_rows = rows            # single full-extent block along rows
    total_blocks = pl.cdiv(rows, block_rows)

    # Split the reduction across a leading "parallel" axis (2 TCs on v7x).
    splits = max(1, min(int(num_splits), int(total_blocks)))
    steps_per_split = pl.cdiv(total_blocks, splits)
    covered = splits * steps_per_split * block_rows * _LANES
    mask_any = covered != N          # pad lanes / partial or phantom blocks

    if splits * steps_per_split == total_blocks:
        in_index = lambda c, j: (0, c * steps_per_split + j, 0)
    else:
        # Clamp phantom trailing blocks; their contribution is fully masked.
        last_block = total_blocks - 1
        in_index = lambda c, j: (
            0, jnp.minimum(c * steps_per_split + j, last_block), 0)

    out_index = lambda c, j: (c, 0, 0)

    kernel = functools.partial(
        _dcs_kernel, alpha=float(alpha), p=p, n_valid=int(N),
        block_rows=int(block_rows), steps_per_split=int(steps_per_split),
        mask_any=bool(mask_any))

    # Explicit VMEM budget: 2 double-buffered inputs + 2 f32 accumulators
    # (+ tiny outputs).  Kept well under v7x's 64 MiB/TC.
    block_elems = B * block_rows * _LANES
    in_bytes = x3.dtype.itemsize + t3.dtype.itemsize
    vmem_needed = (block_elems * (2 * in_bytes + 2 * 4)
                   + 4 * splits * B * _LANES * 4)
    vmem_limit = int(min(64 << 20, max(32 << 20, vmem_needed + (8 << 20))))

    num_part, den_part = pl.pallas_call(
        kernel,
        out_shape=(
            jax.ShapeDtypeStruct((splits, B, _LANES), jnp.float32),
            jax.ShapeDtypeStruct((splits, B, _LANES), jnp.float32),
        ),
        grid_spec=pltpu.PrefetchScalarGridSpec(
            num_scalar_prefetch=0,
            grid=(splits, steps_per_split),
            in_specs=[
                pl.BlockSpec((B, block_rows, _LANES), in_index),
                pl.BlockSpec((B, block_rows, _LANES), in_index),
            ],
            out_specs=[
                pl.BlockSpec((1, B, _LANES), out_index),
                pl.BlockSpec((1, B, _LANES), out_index),
            ],
            scratch_shapes=[
                pltpu.VMEM((B, block_rows, _LANES), jnp.float32),  # num acc
                pltpu.VMEM((B, block_rows, _LANES), jnp.float32),  # den acc
            ],
        ),
        compiler_params=pltpu.CompilerParams(
            dimension_semantics=("parallel", "arbitrary"),
            vmem_limit_bytes=vmem_limit),
    )(x3, t3)

    # Tiny finalize in plain JAX: combine per-split / per-lane partials.
    num = jnp.sum(num_part, axis=(0, 2))                 # (B,)
    den = jnp.sum(den_part, axis=(0, 2)) + smooth        # (B,)
    loss_b = 1.0 - (2.0 * num + smooth) / den

    if reduction == "mean":
        return jnp.mean(loss_b)
    elif reduction == "sum":
        return jnp.sum(loss_b)
    elif reduction == "none":
        return loss_b
    else:
        raise ValueError("Unexpected reduction {}".format(reduction))


def _reference(inputs, target, smooth=1e-4, p=2, alpha=0.01, reduction="mean"):
    B = inputs.shape[0]
    pred = jax.nn.sigmoid(inputs.astype(jnp.float32)).reshape(B, -1)
    tgt = target.astype(jnp.float32).reshape(B, -1)
    pre_pos = pred * (1.0 - pred) ** alpha
    num = jnp.sum(pre_pos * tgt, axis=1)
    den = jnp.sum(pre_pos ** p + tgt ** p, axis=1) + smooth
    loss = 1.0 - (2.0 * num + smooth) / den
    if reduction == "mean":
        return jnp.mean(loss)
    if reduction == "sum":
        return jnp.sum(loss)
    return loss


if __name__ == "__main__":
    key = jax.random.PRNGKey(0)
    k1, k2, k3, k4, k5, k6 = jax.random.split(key, 6)

    # 1) NCHW logits + binary f32 targets; feature size is a multiple of 128
    #    (single lane-dense block, no masking anywhere).
    x = jax.random.normal(k1, (2, 4, 16, 16), dtype=jnp.float32)
    t = (jax.random.uniform(k2, (2, 4, 16, 16)) > 0.5).astype(jnp.float32)
    loss = dcs_loss(x, t)
    jax.block_until_ready(loss)
    ref = _reference(x, t)
    assert jnp.allclose(loss, ref, rtol=1e-5, atol=1e-6), (loss, ref)

    # 2) Non-128-divisible feature size (pad + in-kernel tail masking) and a
    #    narrow bf16 target dtype (in-kernel upcast).
    x2 = jax.random.normal(k3, (2, 3, 10, 10), dtype=jnp.float32)
    t2 = (jax.random.uniform(k4, (2, 3, 10, 10)) > 0.5).astype(jnp.bfloat16)
    loss2 = dcs_loss(x2, t2)
    jax.block_until_ready(loss2)
    ref2 = _reference(x2, t2)
    assert jnp.allclose(loss2, ref2, rtol=1e-5, atol=1e-6), (loss2, ref2)

    # 3) Multi-block grid with the 2-way split, an odd number of row-blocks
    #    (clamped phantom block), a partial last block, and 'sum' reduction.
    x3 = jax.random.normal(k5, (2, 5, 37, 29), dtype=jnp.float32)
    t3 = (jax.random.uniform(k6, (2, 5, 37, 29)) > 0.5).astype(jnp.bfloat16)
    loss3 = dcs_loss(x3, t3, reduction="sum", target_block_bytes=16 * 1024)
    jax.block_until_ready(loss3)
    ref3 = _reference(x3, t3, reduction="sum")
    assert jnp.allclose(loss3, ref3, rtol=1e-5, atol=1e-6), (loss3, ref3)

    print("KERNEL_OK")
</pallas_src>

<mosaic_0001>
module attributes {stable_mosaic.version = 11 : i64} {
  func.func @_dcs_kernel(%arg0: i32, %arg1: i32, %arg2: memref<2x8x128xf32, #tpu.memory_space<vmem>>, %arg3: memref<2x8x128xf32, #tpu.memory_space<vmem>>, %arg4: memref<1x2x128xf32, #tpu.memory_space<vmem>>, %arg5: memref<1x2x128xf32, #tpu.memory_space<vmem>>, %arg6: memref<2x8x128xf32, #tpu.memory_space<vmem>>, %arg7: memref<2x8x128xf32, #tpu.memory_space<vmem>>) attributes {dimension_semantics = [#tpu.dimension_semantics<parallel>, #tpu.dimension_semantics<arbitrary>], iteration_bounds = array<i64: 1, 1>, scalar_prefetch = 0 : i64, scratch_operands = 2 : i64, tpu.core_type = #tpu.core_type<tc>, window_params = [{transform_indices = @transform_0, window_bounds = array<i64: 2, 8, 128>}, {transform_indices = @transform_1, window_bounds = array<i64: 2, 8, 128>}, {transform_indices = @transform_2, window_bounds = array<i64: 1, 2, 128>}, {transform_indices = @transform_3, window_bounds = array<i64: 1, 2, 128>}]} {
    %c0_i32 = arith.constant 0 : i32
    %0 = arith.cmpi eq, %arg1, %c0_i32 : i32
    %1 = arith.extui %0 : i1 to i32
    %c0_i32_0 = arith.constant 0 : i32
    %2 = arith.cmpi ne, %1, %c0_i32_0 : i32
    scf.if %2 {
      %cst_25 = arith.constant 0.000000e+00 : f32
      %37 = vector.broadcast %cst_25 : f32 to vector<2x8x128xf32>
      %c0_26 = arith.constant 0 : index
      %c0_27 = arith.constant 0 : index
      %c0_28 = arith.constant 0 : index
      %38 = vector.load %arg6[%c0_26, %c0_27, %c0_28] : memref<2x8x128xf32, #tpu.memory_space<vmem>>, vector<2x8x128xf32>
      tpu.vector_store %arg6[%c0_26, %c0_27, %c0_28], %37 {strides = array<i32>} : memref<2x8x128xf32, #tpu.memory_space<vmem>>, vector<2x8x128xf32>,
      %cst_29 = arith.constant 0.000000e+00 : f32
      %39 = vector.broadcast %cst_29 : f32 to vector<2x8x128xf32>
      %c0_30 = arith.constant 0 : index
      %c0_31 = arith.constant 0 : index
      %c0_32 = arith.constant 0 : index
      %40 = vector.load %arg7[%c0_30, %c0_31, %c0_32] : memref<2x8x128xf32, #tpu.memory_space<vmem>>, vector<2x8x128xf32>
      tpu.vector_store %arg7[%c0_30, %c0_31, %c0_32], %39 {strides = array<i32>} : memref<2x8x128xf32, #tpu.memory_space<vmem>>, vector<2x8x128xf32>,
    } else {
    }
    %c0 = arith.constant 0 : index
    %c0_1 = arith.constant 0 : index
    %c0_2 = arith.constant 0 : index
    %3 = vector.load %arg2[%c0, %c0_1, %c0_2] : memref<2x8x128xf32, #tpu.memory_space<vmem>>, vector<2x8x128xf32>
    %c0_3 = arith.constant 0 : index
    %c0_4 = arith.constant 0 : index
    %c0_5 = arith.constant 0 : index
    %4 = vector.load %arg3[%c0_3, %c0_4, %c0_5] : memref<2x8x128xf32, #tpu.memory_space<vmem>>, vector<2x8x128xf32>
    %5 = math.absf %3 : vector<2x8x128xf32>
    %cst = arith.constant 0.000000e+00 : f32
    %6 = vector.broadcast %cst : f32 to vector<2x8x128xf32>
    %7 = arith.subf %6, %5 : vector<2x8x128xf32>
    %8 = math.exp %7 : vector<2x8x128xf32>
    %cst_6 = arith.constant 1.000000e+00 : f32
    %9 = vector.broadcast %cst_6 : f32 to vector<2x8x128xf32>
    %10 = arith.addf %9, %8 : vector<2x8x128xf32>
    %cst_7 = arith.constant 1.000000e+00 : f32
    %11 = vector.broadcast %cst_7 : f32 to vector<2x8x128xf32>
    %12 = arith.divf %11, %10 : vector<2x8x128xf32>
    %cst_8 = arith.constant 0.000000e+00 : f32
    %13 = vector.broadcast %cst_8 : f32 to vector<2x8x128xf32>
    %14 = arith.cmpf oge, %3, %13 : vector<2x8x128xf32>
    %15 = arith.mulf %8, %12 : vector<2x8x128xf32>
    %16 = arith.select %14, %12, %15 : vector<2x8x128xi1>, vector<2x8x128xf32>
    %cst_9 = arith.constant 1.000000e+00 : f32
    %17 = vector.broadcast %cst_9 : f32 to vector<2x8x128xf32>
    %18 = arith.subf %17, %16 : vector<2x8x128xf32>
    %19 = math.log %18 : vector<2x8x128xf32>
    %cst_10 = arith.constant 0.00999999977 : f32
    %20 = vector.broadcast %cst_10 : f32 to vector<2x8x128xf32>
    %21 = arith.mulf %20, %19 : vector<2x8x128xf32>
    %22 = math.exp %21 : vector<2x8x128xf32>
    %23 = arith.mulf %16, %22 : vector<2x8x128xf32>
    %24 = arith.mulf %23, %23 : vector<2x8x128xf32>
    %25 = arith.mulf %4, %4 : vector<2x8x128xf32>
    %26 = arith.mulf %23, %4 : vector<2x8x128xf32>
    %27 = arith.addf %24, %25 : vector<2x8x128xf32>
    %c0_11 = arith.constant 0 : index
    %c0_12 = arith.constant 0 : index
    %c0_13 = arith.constant 0 : index
    %28 = vector.load %arg6[%c0_11, %c0_12, %c0_13] : memref<2x8x128xf32, #tpu.memory_space<vmem>>, vector<2x8x128xf32>
    %29 = arith.addf %28, %26 : vector<2x8x128xf32>
    %c0_14 = arith.constant 0 : index
    %c0_15 = arith.constant 0 : index
    %c0_16 = arith.constant 0 : index
    %30 = vector.load %arg6[%c0_14, %c0_15, %c0_16] : memref<2x8x128xf32, #tpu.memory_space<vmem>>, vector<2x8x128xf32>
    tpu.vector_store %arg6[%c0_14, %c0_15, %c0_16], %29 {strides = array<i32>} : memref<2x8x128xf32, #tpu.memory_space<vmem>>, vector<2x8x128xf32>,
    %c0_17 = arith.constant 0 : index
    %c0_18 = arith.constant 0 : index
    %c0_19 = arith.constant 0 : index
    %31 = vector.load %arg7[%c0_17, %c0_18, %c0_19] : memref<2x8x128xf32, #tpu.memory_space<vmem>>, vector<2x8x128xf32>
    %32 = arith.addf %31, %27 : vector<2x8x128xf32>
    %c0_20 = arith.constant 0 : index
    %c0_21 = arith.constant 0 : index
    %c0_22 = arith.constant 0 : index
    %33 = vector.load %arg7[%c0_20, %c0_21, %c0_22] : memref<2x8x128xf32, #tpu.memory_space<vmem>>, vector<2x8x128xf32>
    tpu.vector_store %arg7[%c0_20, %c0_21, %c0_22], %32 {strides = array<i32>} : memref<2x8x128xf32, #tpu.memory_space<vmem>>, vector<2x8x128xf32>,
    %c0_i32_23 = arith.constant 0 : i32
    %34 = arith.cmpi eq, %arg1, %c0_i32_23 : i32
    %35 = arith.extui %34 : i1 to i32
    %c0_i32_24 = arith.constant 0 : i32
    %36 = arith.cmpi ne, %35, %c0_i32_24 : i32
    scf.if %36 {
      %c0_25 = arith.constant 0 : index
      %c0_26 = arith.constant 0 : index
      %c0_27 = arith.constant 0 : index
      %37 = vector.load %arg6[%c0_25, %c0_26, %c0_27] : memref<2x8x128xf32, #tpu.memory_space<vmem>>, vector<2x8x128xf32>
      %cst_28 = arith.constant dense<0.000000e+00> : vector<2x128xf32>
      %38 = vector.multi_reduction <add>, %37, %cst_28 [1] : vector<2x8x128xf32> to vector<2x128xf32>
      %39 = vector.shape_cast %38 : vector<2x128xf32> to vector<1x2x128xf32>
      %c0_29 = arith.constant 0 : index
      %c0_30 = arith.constant 0 : index
      %c0_31 = arith.constant 0 : index
      %40 = vector.load %arg4[%c0_29, %c0_30, %c0_31] : memref<1x2x128xf32, #tpu.memory_space<vmem>>, vector<1x2x128xf32>
      tpu.vector_store %arg4[%c0_29, %c0_30, %c0_31], %39 {strides = array<i32>} : memref<1x2x128xf32, #tpu.memory_space<vmem>>, vector<1x2x128xf32>,
      %c0_32 = arith.constant 0 : index
      %c0_33 = arith.constant 0 : index
      %c0_34 = arith.constant 0 : index
      %41 = vector.load %arg7[%c0_32, %c0_33, %c0_34] : memref<2x8x128xf32, #tpu.memory_space<vmem>>, vector<2x8x128xf32>
      %cst_35 = arith.constant dense<0.000000e+00> : vector<2x128xf32>
      %42 = vector.multi_reduction <add>, %41, %cst_35 [1] : vector<2x8x128xf32> to vector<2x128xf32>
      %43 = vector.shape_cast %42 : vector<2x128xf32> to vector<1x2x128xf32>
      %c0_36 = arith.constant 0 : index
      %c0_37 = arith.constant 0 : index
      %c0_38 = arith.constant 0 : index
      %44 = vector.load %arg5[%c0_36, %c0_37, %c0_38] : memref<1x2x128xf32, #tpu.memory_space<vmem>>, vector<1x2x128xf32>
      tpu.vector_store %arg5[%c0_36, %c0_37, %c0_38], %43 {strides = array<i32>} : memref<1x2x128xf32, #tpu.memory_space<vmem>>, vector<1x2x128xf32>,
    } else {
    }
    return
  }
  func.func @transform_0(%arg0: i32, %arg1: i32) -> (i32, i32, i32) {
    %c1_i32 = arith.constant 1 : i32
    %0 = arith.muli %arg0, %c1_i32 : i32
    %1 = arith.addi %0, %arg1 : i32
    %c0_i32 = arith.constant 0 : i32
    %c0_i32_0 = arith.constant 0 : i32
    %c0_i32_1 = arith.constant 0 : i32
    return %c0_i32, %1, %c0_i32_0 : i32, i32, i32
  }
  func.func @transform_1(%arg0: i32, %arg1: i32) -> (i32, i32, i32) {
    %c1_i32 = arith.constant 1 : i32
    %0 = arith.muli %arg0, %c1_i32 : i32
    %1 = arith.addi %0, %arg1 : i32
    %c0_i32 = arith.constant 0 : i32
    %c0_i32_0 = arith.constant 0 : i32
    %c0_i32_1 = arith.constant 0 : i32
    return %c0_i32, %1, %c0_i32_0 : i32, i32, i32
  }
  func.func @transform_2(%arg0: i32, %arg1: i32) -> (i32, i32, i32) {
    %c0_i32 = arith.constant 0 : i32
    %c0_i32_0 = arith.constant 0 : i32
    %c0_i32_1 = arith.constant 0 : i32
    return %arg0, %c0_i32, %c0_i32_0 : i32, i32, i32
  }
  func.func @transform_3(%arg0: i32, %arg1: i32) -> (i32, i32, i32) {
    %c0_i32 = arith.constant 0 : i32
    %c0_i32_0 = arith.constant 0 : i32
    %c0_i32_1 = arith.constant 0 : i32
    return %arg0, %c0_i32, %c0_i32_0 : i32, i32, i32
  }
}

</mosaic_0001>

<bundles_post_ra>
// kernel: tpu_custom_call.1
= control target key start
LH: loop header
LB: loop body
LE: loop exit
PB: predicated region body
PF: predicated region fallthrough
CT: control target
= control target key end

     0   :  { %9 = vsyncpa [#allocation5], 0  ;;  %s337_s0 = inlined_call_operand.hbm [shape: f32[2,8,128], index: 0, kind: input, shape index: {}]   ;;  %s338_s1 = inlined_call_operand.hbm [shape: f32[2,8,128], index: 1, kind: input, shape index: {}]   ;;  %s339_s2 = inlined_call_operand.hbm [shape: f32[1,2,128], index: 2, kind: output, shape index: {0}]   ;;  %s340_s3 = inlined_call_operand.hbm [shape: f32[1,2,128], index: 3, kind: output, shape index: {1}]  }
   0x1   :  { %10 = vsyncpa [#allocation8], 0 }
   0x2   :  { %11 = vsyncpa [#allocation6], 0 }
   0x3   :  { %12 = vsyncpa [#allocation11], 0  ;;  %s299_s12 = smov [#allocation4]  }
   0x4   :  { %s21_s13 = sshll.u32 %s299_s12, 4  ;;  %s22_s13 = int_to_ptr.vmem [resolvable:$true] %s21_s13 }
   0x5   :  { %s219_s14 = scalar_lea.vmem %s22_s13, 256  ;;  %p224_p1 = scmp.lt.s32.totalorder %s22_s13, %s22_s13 }
   0x6   :  { %p220_p0 = scmp.ne.s32.totalorder %s22_s13, %s219_s14  ;;  %p225_p2 = scmp.lt.s32.totalorder %s219_s14, %s219_s14 }
   0x8   :  { %p226_p3 = por %p225_p2, %p224_p1 }
   0xa   :  { %p227_p4 = pnand %p226_p3, %p220_p0 }
   0xc   :  { %230 = shalt.err (!%p227_p4)
}
   0xd   :  { %s300_s15 = smov 128   ;;  %s301_s16 = smov 8  }
   0xe   :  { %27 = dma.hbm_to_vmem [thread:$0]  %s337_s0, 256, %s22_s13, [#allocation5], %s300_s15, %s300_s15, %s301_s16  }
   0xf   :  { %s302_s19 = smov [#allocation7]  }
  0x10   :  { %s36_s20 = sshll.u32 %s302_s19, 4  ;;  %s37_s20 = int_to_ptr.vmem [resolvable:$true] %s36_s20 }
  0x11   :  { %s239_s21 = scalar_lea.vmem %s37_s20, 256  ;;  %p244_p6 = scmp.lt.s32.totalorder %s37_s20, %s37_s20 }
  0x12   :  { %p240_p5 = scmp.ne.s32.totalorder %s37_s20, %s239_s21  ;;  %p245_p7 = scmp.lt.s32.totalorder %s239_s21, %s239_s21 }
  0x14   :  { %p246_p8 = por %p245_p7, %p244_p6 }
  0x16   :  { %p247_p9 = pnand %p246_p8, %p240_p5 }
  0x18   :  { %250 = shalt.err (!%p247_p9)
}
  0x19   :  { %42 = dma.hbm_to_vmem [thread:$0]  %s338_s1, 256, %s37_s20, [#allocation8], %s300_s15, %s300_s15, %s301_s16  }
  0x1a   :  { %291 = dma.done.wait [#allocation5], 256  }
  0x1b   :  { %292 = vsyncadd [#allocation5], 4294967040 }
  0x1c   :  { %293 = dma.done.wait [#allocation8], 256  }
  0x1d   :  { %294 = vsyncadd [#allocation8], 4294967040  ;;  %v59_v0 = vld [vmem:[#allocation4] sm:$0xff]  ;;  %v60_v1 = vld [vmem:[#allocation4 + $0x8] sm:$0xff]  ;;  %s303_s0 = smov [#allocation9]   ;;  %vm136_vm2 = vcmask 1041409  }
  0x1e   :  { %v63_v2 = vand.u32 2147483647, %v59_v0  ;;  %v64_v3 = vand.u32 2147483647, %v60_v1  ;;  %vm77_vm0 = vcmp.ge.f32.partialorder %v59_v0, 0.0  ;;  %vm78_vm1 = vcmp.ge.f32.partialorder %v60_v1, 0.0 }
  0x1f   :  { %v61_v28 = vld [vmem:[#allocation7] sm:$0xff]  ;;  %v62_v29 = vld [vmem:[#allocation7 + $0x8] sm:$0xff]  ;;  %s165_s1 = sshll.u32 %s303_s0, 4  ;;  %s304_s24 = smov [#allocation10]   ;;  %s166_s1 = int_to_ptr.vmem [resolvable:$true] %s165_s1 }
  0x20   :  { %v65_v4 = vsub.f32 0.0, %v63_v2  ;;  %v66_v5 = vsub.f32 0.0, %v64_v3  ;;  %v99_v33 = vmul.f32 %v61_v28, %v61_v28  ;;  %v100_v35 = vmul.f32 %v62_v29, %v62_v29  ;;  %s175_s25 = sshll.u32 %s304_s24, 4  ;;  %s251_s26 = scalar_lea.vmem %s166_s1, 32  ;;  %s176_s25 = int_to_ptr.vmem [resolvable:$true] %s175_s25 }
  0x21   :  { %p252_p10 = scmp.ne.s32.totalorder %s166_s1, %s251_s26  ;;  %p256_p11 = scmp.lt.s32.totalorder %s166_s1, %s166_s1 }
  0x22   :  { %v67_v6 = vmul.f32 1.442695, %v65_v4  ;;  %v69_v7 = vmul.f32 1.442695, %v66_v5  ;;  %p257_p12 = scmp.lt.s32.totalorder %s251_s26, %s251_s26 }
  0x24   :  { %195 = vpow2.f32 %v67_v6  ;;  %p258_p13 = por %p257_p12, %p256_p11 }
  0x25   :  { %197 = vpow2.f32 %v69_v7 }
  0x26   :  { %p259_p0 = pnand %p258_p13, %p252_p10 }
  0x31   :  { %v196_v8 = vpop.eup %195 }
  0x32   :  { %v198_v9 = vpop.eup %197  ;;  %v71_v10 = vadd.f32 1.0, %v196_v8 }
  0x33   :  { %v72_v11 = vadd.f32 1.0, %v198_v9 }
  0x34   :  { %199 = vrcp.f32 %v71_v10 }
  0x35   :  { %201 = vrcp.f32 %v72_v11 }
  0x41   :  { %v200_v12 = vpop.eup %199 }
  0x42   :  { %v202_v13 = vpop.eup %201  ;;  %v79_v14 = vmul.f32 %v200_v12, %v196_v8 }
  0x43   :  { %v80_v15 = vmul.f32 %v202_v13, %v198_v9 }
  0x44   :  { %v81_v16 = vsel %vm77_vm0, %v200_v12, %v79_v14 }
  0x45   :  { %v82_v17 = vsel %vm78_vm1, %v202_v13, %v80_v15  ;;  %v83_v18 = vsub.f32 1.0, %v81_v16 }
  0x46   :  { %v84_v19 = vsub.f32 1.0, %v82_v17 }
  0x47   :  { %203 = vlog2.f32 %v83_v18 }
  0x48   :  { %205 = vlog2.f32 %v84_v19 }
  0x54   :  { %v204_v20 = vpop.eup %203 }
  0x55   :  { %v206_v21 = vpop.eup %205  ;;  %v86_v22 = vmul.f32 0.6931472, %v204_v20 }
  0x56   :  { %v88_v23 = vmul.f32 0.6931472, %v206_v21 }
  0x57   :  { %v89_v24 = vmul.f32 0.01, %v86_v22 }
  0x58   :  { %v90_v25 = vmul.f32 0.01, %v88_v23 }
  0x59   :  { %v91_v26 = vmul.f32 1.442695, %v89_v24 }
  0x5a   :  { %v93_v27 = vmul.f32 1.442695, %v90_v25 }
  0x5b   :  { %207 = vpow2.f32 %v91_v26 }
  0x5c   :  { %209 = vpow2.f32 %v93_v27 }
  0x68   :  { %v208_v30 = vpop.eup %207 }
  0x69   :  { %v210_v31 = vpop.eup %209  ;;  %v95_v32 = vmul.f32 %v208_v30, %v81_v16 }
  0x6a   :  { %v96_v34 = vmul.f32 %v210_v31, %v82_v17 }
  0x6b   :  { %v101_v36 = vmul.f32 %v95_v32, %v61_v28  ;;  %v97_v37 = vmul.f32 %v95_v32, %v95_v32 }
  0x6c   :  { %v102_v38 = vmul.f32 %v96_v34, %v62_v29  ;;  %v98_v39 = vmul.f32 %v96_v34, %v96_v34 }
  0x6d   :  { %v122_v40 = vrot.slane %v101_v36, 4  ;;  %v103_v41 = vadd.f32 %v99_v33, %v97_v37 }
  0x6e   :  { %v128_v42 = vrot.slane %v102_v38, 4  ;;  %v104_v43 = vadd.f32 %v100_v35, %v98_v39 }
  0x6f   :  { %v123_v44 = vadd.f32 %v122_v40, %v101_v36  ;;  %v142_v45 = vrot.slane %v103_v41, 4 }
  0x70   :  { %v129_v46 = vadd.f32 %v128_v42, %v102_v38  ;;  %v148_v47 = vrot.slane %v104_v43, 4 }
  0x71   :  { %v124_v48 = vrot.slane %v123_v44, 2  ;;  %v143_v49 = vadd.f32 %v142_v45, %v103_v41 }
  0x72   :  { %v130_v50 = vrot.slane %v129_v46, 2  ;;  %v149_v51 = vadd.f32 %v148_v47, %v104_v43 }
  0x73   :  { %v125_v52 = vadd.f32 %v124_v48, %v123_v44  ;;  %v144_v53 = vrot.slane %v143_v49, 2 }
  0x74   :  { %v131_v54 = vadd.f32 %v130_v50, %v129_v46  ;;  %v150_v55 = vrot.slane %v149_v51, 2 }
  0x75   :  { %v126_v56 = vrot.slane %v125_v52, 1  ;;  %v145_v57 = vadd.f32 %v144_v53, %v143_v49 }
  0x76   :  { %v132_v58 = vrot.slane %v131_v54, 1  ;;  %v151_v59 = vadd.f32 %v150_v55, %v149_v51 }
  0x77   :  { %v127_v60 = vadd.f32 %v126_v56, %v125_v52  ;;  %v146_v61 = vrot.slane %v145_v57, 1 }
  0x78   :  { %v133_v62 = vadd.f32 %v132_v58, %v131_v54  ;;  %v152_v63 = vrot.slane %v151_v59, 1 }
  0x79   :  { %v147_v0 = vadd.f32 %v146_v61, %v145_v57 }
  0x7a   :  { %v137_v1 = vsel %vm136_vm2, %v133_v62, %v127_v60  ;;  %v153_v2 = vadd.f32 %v152_v63, %v151_v59 }
  0x7b   :  { %139 = vst [vmem:[#allocation9] sm:$0x3] %v137_v1 }
  0x7c   :  { %v156_v3 = vsel %vm136_vm2, %v153_v2, %v147_v0 }
  0x7d   :  { %262 = shalt.err (!%p259_p0)
}
  0x7e   :  { %168 = dma.vmem_to_hbm [thread:$0]  %s166_s1, 32, %s339_s2, [#allocation6]   ;;  %158 = vst [vmem:[#allocation10] sm:$0x3] %v156_v3 }
  0x7f   :  { %s271_s29 = scalar_lea.vmem %s176_s25, 32  ;;  %p276_p2 = scmp.lt.s32.totalorder %s176_s25, %s176_s25 }
  0x80   :  { %p272_p1 = scmp.ne.s32.totalorder %s176_s25, %s271_s29  ;;  %p277_p3 = scmp.lt.s32.totalorder %s271_s29, %s271_s29 }
  0x82   :  { %p278_p4 = por %p277_p3, %p276_p2 }
  0x84   :  { %p279_p5 = pnand %p278_p4, %p272_p1 }
  0x86   :  { %282 = shalt.err (!%p279_p5)
}
  0x87   :  { %178 = dma.vmem_to_hbm [thread:$0]  %s176_s25, 32, %s340_s3, [#allocation11]  }
  0x88   :  { %295 = dma.done.wait [#allocation6], 32  }
  0x89   :  { %296 = vsyncadd [#allocation6], 4294967264 }
  0x8a   :  { %297 = dma.done.wait [#allocation11], 32  }
  0x8b   :  { %298 = vsyncadd [#allocation11], 4294967264 }
  0x8c   :  { %185 = vsyncpa [#allocation5], 1 }
  0x8d   :  { %186 = vsyncpa [#allocation8], 1 }
  0x8e   :  { %187 = vsyncpa [#allocation6], 1 }
  0x8f   :  { %188 = vsyncpa [#allocation11], 1 }

</bundles_post_ra>
